<compile_context>
chip_gen: v7x
topology: tpu7x:2x2x1
jax: 0.10.0
libtpu: 0.0.40
codegen_flags: <defaults>
</compile_context>

<pallas_src>
import jax
import jax.numpy as jnp
import numpy as np
from jax import lax
from jax.experimental import pallas as pl
from jax.experimental.pallas import tpu as pltpu


def _round_up(x, m):
    return ((x + m - 1) // m) * m


# ---------------------------------------------------------------------------
# Generic tiled matmul + bias kernel (used for input and vocab projections).
# ---------------------------------------------------------------------------
def matmul_bias_kernel(a_ref, b_ref, bias_ref, o_ref):
    o_ref[...] = (jnp.dot(a_ref[...], b_ref[...],
                          preferred_element_type=jnp.float32)
                  + bias_ref[...]).astype(o_ref.dtype)


def matmul_bias(a, b, bias, *, tm=256, tn=512, out_dtype=jnp.float32):
    """a: (M, K) bf16, b: (K, N) bf16, bias: (1, N) f32 -> (M, N) out_dtype.

    K is kept as a single block (K <= a few hundred here); M and N are tiled
    over a fully parallel grid.  M/N are padded with zeros to tile multiples.
    """
    M, K = a.shape
    Kb, N = b.shape
    assert K == Kb
    tm = min(tm, _round_up(M, 8))
    tn = min(tn, _round_up(N, 128))
    Mp = _round_up(M, tm)
    Np = _round_up(N, tn)
    if Mp != M:
        a = jnp.pad(a, ((0, Mp - M), (0, 0)))
    if Np != N:
        b = jnp.pad(b, ((0, 0), (0, Np - N)))
        bias = jnp.pad(bias, ((0, 0), (0, Np - N)))

    out = pl.pallas_call(
        matmul_bias_kernel,
        out_shape=jax.ShapeDtypeStruct((Mp, Np), out_dtype),
        grid_spec=pltpu.PrefetchScalarGridSpec(
            num_scalar_prefetch=0,
            grid=(Mp // tm, Np // tn),
            in_specs=[
                pl.BlockSpec((tm, K), lambda i, j: (i, 0)),
                pl.BlockSpec((K, tn), lambda i, j: (0, j)),
                pl.BlockSpec((1, tn), lambda i, j: (0, j)),
            ],
            out_specs=pl.BlockSpec((tm, tn), lambda i, j: (i, j)),
        ),
        compiler_params=pltpu.CompilerParams(
            dimension_semantics=("parallel", "parallel")),
    )(a, b, bias)
    return out[:M, :N]


# ---------------------------------------------------------------------------
# LSTM recurrence kernel: one invocation, lax.fori_loop over time inside.
# ---------------------------------------------------------------------------
def lstm_recurrence_kernel(gx_ref, whh_ref, h0_ref, c0_ref,
                           hseq_ref, hN_ref, cN_ref):
    """gx_ref: (S, Bp, 4*Hp) f32 precomputed x_t @ W_ih^T + b.
    whh_ref: (Hp, 4*Hp) bf16.  h0/c0: (Bp, Hp) f32.
    Gate order follows PyTorch nn.LSTM: [i, f, g, o]."""
    Hp = h0_ref.shape[-1]
    S = gx_ref.shape[0]
    w_hh = whh_ref[...]                          # resident bf16 weight

    def step(t, carry):
        h, c = carry                             # f32 (Bp, Hp)
        gates = gx_ref[t] + jnp.dot(h.astype(jnp.bfloat16), w_hh,
                                    preferred_element_type=jnp.float32)
        i_g = jax.nn.sigmoid(gates[:, 0 * Hp:1 * Hp])
        f_g = jax.nn.sigmoid(gates[:, 1 * Hp:2 * Hp])
        g_g = jnp.tanh(gates[:, 2 * Hp:3 * Hp])
        o_g = jax.nn.sigmoid(gates[:, 3 * Hp:4 * Hp])
        c_new = f_g * c + i_g * g_g
        h_new = o_g * jnp.tanh(c_new)
        hseq_ref[t] = h_new
        return (h_new, c_new)

    hN, cN = lax.fori_loop(0, S, step, (h0_ref[...], c0_ref[...]))
    hN_ref[...] = hN
    cN_ref[...] = cN


def lstm_recurrence(gates_x, w_hh_t, h0, c0):
    S, Bp, G = gates_x.shape
    Hp = h0.shape[-1]
    return pl.pallas_call(
        lstm_recurrence_kernel,
        out_shape=(
            jax.ShapeDtypeStruct((S, Bp, Hp), jnp.float32),   # h sequence
            jax.ShapeDtypeStruct((Bp, Hp), jnp.float32),      # h final
            jax.ShapeDtypeStruct((Bp, Hp), jnp.float32),      # c final
        ),
        grid_spec=pltpu.PrefetchScalarGridSpec(
            num_scalar_prefetch=0,
            grid=(1,),
            in_specs=[
                pl.BlockSpec((S, Bp, G), lambda i: (0, 0, 0)),
                pl.BlockSpec((Hp, G), lambda i: (0, 0)),
                pl.BlockSpec((Bp, Hp), lambda i: (0, 0)),
                pl.BlockSpec((Bp, Hp), lambda i: (0, 0)),
            ],
            out_specs=[
                pl.BlockSpec((S, Bp, Hp), lambda i: (0, 0, 0)),
                pl.BlockSpec((Bp, Hp), lambda i: (0, 0)),
                pl.BlockSpec((Bp, Hp), lambda i: (0, 0)),
            ],
        ),
        compiler_params=pltpu.CompilerParams(
            dimension_semantics=("arbitrary",)),
    )(gates_x, w_hh_t, h0, c0)


# ---------------------------------------------------------------------------
# Full forward pass (matches RNNModel.forward).
# ---------------------------------------------------------------------------
def rnn_model_forward(x_tokens, params, prev_state):
    """x_tokens: (S, B) int32; prev_state: (h0, c0) each (1, B, H).

    Returns (logits (S, B, V), (hN, cN) each (1, B, H))."""
    emb_table = params["embedding"]        # (V, E) f32
    w_ih_t = params["w_ih_t"]              # (E, 4*Hp)  bf16
    w_hh_t = params["w_hh_t"]              # (Hp, 4*Hp) bf16
    b_gate = params["b_gate"]              # (1, 4*Hp)  f32
    w_dense_t = params["w_dense_t"]        # (Hp, Vp)   bf16
    b_dense = params["b_dense"]            # (1, Vp)    f32

    S, B = x_tokens.shape
    V, E = emb_table.shape
    Hp = w_hh_t.shape[0]
    Vp = w_dense_t.shape[1]
    H = prev_state[0].shape[-1]
    Bp = _round_up(B, 8)

    # 1) Embedding gather (glue) + batch pad, cast activations to bf16.
    # TODO(synk): embedding row gather stays in plain JAX (data-dependent gather).
    embed = jnp.take(emb_table, x_tokens, axis=0)              # (S, B, E) f32
    embed = jnp.pad(embed, ((0, 0), (0, Bp - B), (0, 0)))      # (S, Bp, E)
    embed_bf = embed.astype(jnp.bfloat16)

    # 2) Input projection hoisted out of the recurrence: one big MXU matmul.
    gates_x = matmul_bias(embed_bf.reshape(S * Bp, E), w_ih_t, b_gate)
    gates_x = gates_x.reshape(S, Bp, 4 * Hp)                   # f32

    # 3) LSTM recurrence (single kernel invocation, in-kernel time loop).
    h0 = jnp.pad(prev_state[0].reshape(B, H), ((0, Bp - B), (0, Hp - H)))
    c0 = jnp.pad(prev_state[1].reshape(B, H), ((0, Bp - B), (0, Hp - H)))
    h_seq, hN, cN = lstm_recurrence(gates_x, w_hh_t, h0, c0)

    # 4) Vocab projection as one big MXU matmul over all S*Bp rows.
    logits = matmul_bias(h_seq.reshape(S * Bp, Hp).astype(jnp.bfloat16),
                         w_dense_t, b_dense)
    logits = logits.reshape(S, Bp, Vp)[:, :B, :V]

    return logits, (hN[:B, :H][None], cN[:B, :H][None])


# ---------------------------------------------------------------------------
# Parameters (PyTorch-layout raw params + padded/transposed kernel params).
# ---------------------------------------------------------------------------
def init_params(key, n_vocab, embedding_size, rnn_size):
    k = jax.random.split(key, 7)
    H = rnn_size
    bound = 1.0 / np.sqrt(H)
    emb = jax.random.normal(k[0], (n_vocab, embedding_size), jnp.float32)
    w_ih = jax.random.uniform(k[1], (4 * H, embedding_size), jnp.float32, -bound, bound)
    w_hh = jax.random.uniform(k[2], (4 * H, H), jnp.float32, -bound, bound)
    b_ih = jax.random.uniform(k[3], (4 * H,), jnp.float32, -bound, bound)
    b_hh = jax.random.uniform(k[4], (4 * H,), jnp.float32, -bound, bound)
    db = 1.0 / np.sqrt(H)
    w_d = jax.random.uniform(k[5], (n_vocab, H), jnp.float32, -db, db)
    b_d = jax.random.uniform(k[6], (n_vocab,), jnp.float32, -db, db)
    return {"embedding": emb, "w_ih": w_ih, "w_hh": w_hh,
            "b_ih": b_ih, "b_hh": b_hh, "w_dense": w_d, "b_dense": b_d}


def prepare_params(raw):
    """Transpose, pad (per-gate lane alignment) and bf16-cast the weights."""
    H = raw["w_hh"].shape[1]
    V, E = raw["embedding"].shape
    Hp = _round_up(H, 128)
    Vp = _round_up(V, 128)

    def pad_gates_last(m):                       # (..., 4H) -> (..., 4*Hp)
        parts = jnp.split(m, 4, axis=-1)
        parts = [jnp.pad(p, [(0, 0)] * (p.ndim - 1) + [(0, Hp - H)]) for p in parts]
        return jnp.concatenate(parts, axis=-1)

    w_ih_t = pad_gates_last(raw["w_ih"].T)                           # (E, 4Hp)
    w_hh_t = pad_gates_last(raw["w_hh"].T)                           # (H, 4Hp)
    w_hh_t = jnp.pad(w_hh_t, ((0, Hp - H), (0, 0)))                  # (Hp, 4Hp)
    b_gate = pad_gates_last((raw["b_ih"] + raw["b_hh"])[None])       # (1, 4Hp)
    w_dense_t = jnp.pad(raw["w_dense"].T, ((0, Hp - H), (0, Vp - V)))  # (Hp, Vp)
    b_dense = jnp.pad(raw["b_dense"][None], ((0, 0), (0, Vp - V)))     # (1, Vp)

    return {
        "embedding": raw["embedding"],                 # (V, E) f32
        "w_ih_t": w_ih_t.astype(jnp.bfloat16),
        "w_hh_t": w_hh_t.astype(jnp.bfloat16),
        "b_gate": b_gate.astype(jnp.float32),
        "w_dense_t": w_dense_t.astype(jnp.bfloat16),
        "b_dense": b_dense.astype(jnp.float32),
    }


# ---------------------------------------------------------------------------
# Pure-JAX reference (lax.scan LSTM) mirroring the bf16/f32 mixed precision.
# ---------------------------------------------------------------------------
def reference_forward(x_tokens, raw, prev_state):
    H = raw["w_hh"].shape[1]
    B = x_tokens.shape[1]
    w_ih_t = raw["w_ih"].T.astype(jnp.bfloat16)
    w_hh_t = raw["w_hh"].T.astype(jnp.bfloat16)
    b_gate = (raw["b_ih"] + raw["b_hh"])[None]
    w_d_t = raw["w_dense"].T.astype(jnp.bfloat16)
    b_d = raw["b_dense"][None]

    embed = jnp.take(raw["embedding"], x_tokens, axis=0).astype(jnp.bfloat16)
    gx = jnp.dot(embed, w_ih_t, preferred_element_type=jnp.float32) + b_gate

    h0 = prev_state[0].reshape(B, H)
    c0 = prev_state[1].reshape(B, H)

    def step(carry, gx_t):
        h, c = carry
        gates = gx_t + jnp.dot(h.astype(jnp.bfloat16), w_hh_t,
                               preferred_element_type=jnp.float32)
        i = jax.nn.sigmoid(gates[:, 0 * H:1 * H])
        f = jax.nn.sigmoid(gates[:, 1 * H:2 * H])
        g = jnp.tanh(gates[:, 2 * H:3 * H])
        o = jax.nn.sigmoid(gates[:, 3 * H:4 * H])
        c_new = f * c + i * g
        h_new = o * jnp.tanh(c_new)
        return (h_new, c_new), h_new

    (hN, cN), hs = lax.scan(step, (h0, c0), gx)
    logits = jnp.dot(hs.astype(jnp.bfloat16), w_d_t,
                     preferred_element_type=jnp.float32) + b_d
    return logits, (hN[None], cN[None])


if __name__ == "__main__":
    # Small shapes consistent with the module's forward.
    n_vocab = 64
    seq_size = 8
    batch = 4
    embedding_size = 32
    rnn_size = 32

    key = jax.random.PRNGKey(0)
    pkey, xkey = jax.random.split(key)
    raw_params = init_params(pkey, n_vocab, embedding_size, rnn_size)
    params = prepare_params(raw_params)

    x = jax.random.randint(xkey, (seq_size, batch), 0, n_vocab, jnp.int32)
    zero_state = (jnp.zeros((1, batch, rnn_size), jnp.float32),
                  jnp.zeros((1, batch, rnn_size), jnp.float32))

    fwd = jax.jit(rnn_model_forward)
    logits, (hN, cN) = fwd(x, params, zero_state)
    jax.block_until_ready(logits)
    jax.block_until_ready(hN)
    jax.block_until_ready(cN)

    ref_logits, (ref_h, ref_c) = reference_forward(x, raw_params, zero_state)
    assert logits.shape == (seq_size, batch, n_vocab)
    assert hN.shape == (1, batch, rnn_size) and cN.shape == (1, batch, rnn_size)
    np.testing.assert_allclose(np.asarray(logits), np.asarray(ref_logits),
                               rtol=1e-2, atol=1e-2)
    np.testing.assert_allclose(np.asarray(hN), np.asarray(ref_h),
                               rtol=1e-2, atol=1e-2)
    np.testing.assert_allclose(np.asarray(cN), np.asarray(ref_c),
                               rtol=1e-2, atol=1e-2)
    print("KERNEL_OK")
</pallas_src>

<mosaic_0001>
module attributes {stable_mosaic.version = 11 : i64} {
  func.func @matmul_bias_kernel(%arg0: i32, %arg1: i32, %arg2: memref<64x32xbf16, #tpu.memory_space<vmem>>, %arg3: memref<32x512xbf16, #tpu.memory_space<vmem>>, %arg4: memref<1x512xf32, #tpu.memory_space<vmem>>, %arg5: memref<64x512xf32, #tpu.memory_space<vmem>>) attributes {dimension_semantics = [#tpu.dimension_semantics<parallel>, #tpu.dimension_semantics<parallel>], iteration_bounds = array<i64: 1, 1>, scalar_prefetch = 0 : i64, scratch_operands = 0 : i64, tpu.core_type = #tpu.core_type<tc>, window_params = [{transform_indices = @transform_0, window_bounds = array<i64: 64, 32>}, {transform_indices = @transform_1, window_bounds = array<i64: 32, 512>}, {transform_indices = @transform_2, window_bounds = array<i64: 1, 512>}, {transform_indices = @transform_3, window_bounds = array<i64: 64, 512>}]} {
    %c0 = arith.constant 0 : index
    %c0_0 = arith.constant 0 : index
    %0 = vector.load %arg2[%c0, %c0_0] : memref<64x32xbf16, #tpu.memory_space<vmem>>, vector<64x32xbf16>
    %c0_1 = arith.constant 0 : index
    %c0_2 = arith.constant 0 : index
    %1 = vector.load %arg3[%c0_1, %c0_2] : memref<32x512xbf16, #tpu.memory_space<vmem>>, vector<32x512xbf16>
    %cst = arith.constant dense<0.000000e+00> : vector<64x512xf32>
    %2 = tpu.matmul %0, %1, %cst {dimension_numbers = #tpu.dot_dimension_numbers<[1], [0], [0], [1], [0, 0, 1, 1], [], []>} : vector<64x32xbf16>, vector<32x512xbf16>, vector<64x512xf32> -> vector<64x512xf32>
    %c0_3 = arith.constant 0 : index
    %c0_4 = arith.constant 0 : index
    %3 = vector.load %arg4[%c0_3, %c0_4] : memref<1x512xf32, #tpu.memory_space<vmem>>, vector<1x512xf32>
    %4 = vector.broadcast %3 : vector<1x512xf32> to vector<64x512xf32>
    %5 = arith.addf %2, %4 : vector<64x512xf32>
    %c0_5 = arith.constant 0 : index
    %c0_6 = arith.constant 0 : index
    %6 = vector.load %arg5[%c0_5, %c0_6] : memref<64x512xf32, #tpu.memory_space<vmem>>, vector<64x512xf32>
    tpu.vector_store %arg5[%c0_5, %c0_6], %5 {strides = array<i32>} : memref<64x512xf32, #tpu.memory_space<vmem>>, vector<64x512xf32>,
    return
  }
  func.func @transform_0(%arg0: i32, %arg1: i32) -> (i32, i32) {
    %c0_i32 = arith.constant 0 : i32
    %c0_i32_0 = arith.constant 0 : i32
    return %arg0, %c0_i32 : i32, i32
  }
  func.func @transform_1(%arg0: i32, %arg1: i32) -> (i32, i32) {
    %c0_i32 = arith.constant 0 : i32
    %c0_i32_0 = arith.constant 0 : i32
    return %c0_i32, %arg1 : i32, i32
  }
  func.func @transform_2(%arg0: i32, %arg1: i32) -> (i32, i32) {
    %c0_i32 = arith.constant 0 : i32
    %c0_i32_0 = arith.constant 0 : i32
    return %c0_i32, %arg1 : i32, i32
  }
  func.func @transform_3(%arg0: i32, %arg1: i32) -> (i32, i32) {
    %c0_i32 = arith.constant 0 : i32
    return %arg0, %arg1 : i32, i32
  }
}

module attributes {stable_mosaic.version = 11 : i64} {
  func.func @matmul_bias_kernel(%arg0: i32, %arg1: i32, %arg2: memref<64x128xbf16, #tpu.memory_space<vmem>>, %arg3: memref<128x128xbf16, #tpu.memory_space<vmem>>, %arg4: memref<1x128xf32, #tpu.memory_space<vmem>>, %arg5: memref<64x128xf32, #tpu.memory_space<vmem>>) attributes {dimension_semantics = [#tpu.dimension_semantics<parallel>, #tpu.dimension_semantics<parallel>], iteration_bounds = array<i64: 1, 1>, scalar_prefetch = 0 : i64, scratch_operands = 0 : i64, tpu.core_type = #tpu.core_type<tc>, window_params = [{transform_indices = @transform_0, window_bounds = array<i64: 64, 128>}, {transform_indices = @transform_1, window_bounds = array<i64: 128, 128>}, {transform_indices = @transform_2, window_bounds = array<i64: 1, 128>}, {transform_indices = @transform_3, window_bounds = array<i64: 64, 128>}]} {
    %c0 = arith.constant 0 : index
    %c0_0 = arith.constant 0 : index
    %0 = vector.load %arg2[%c0, %c0_0] : memref<64x128xbf16, #tpu.memory_space<vmem>>, vector<64x128xbf16>
    %c0_1 = arith.constant 0 : index
    %c0_2 = arith.constant 0 : index
    %1 = vector.load %arg3[%c0_1, %c0_2] : memref<128x128xbf16, #tpu.memory_space<vmem>>, vector<128x128xbf16>
    %cst = arith.constant dense<0.000000e+00> : vector<64x128xf32>
    %2 = tpu.matmul %0, %1, %cst {dimension_numbers = #tpu.dot_dimension_numbers<[1], [0], [0], [1], [0, 0, 1, 1], [], []>} : vector<64x128xbf16>, vector<128x128xbf16>, vector<64x128xf32> -> vector<64x128xf32>
    %c0_3 = arith.constant 0 : index
    %c0_4 = arith.constant 0 : index
    %3 = vector.load %arg4[%c0_3, %c0_4] : memref<1x128xf32, #tpu.memory_space<vmem>>, vector<1x128xf32>
    %4 = vector.broadcast %3 : vector<1x128xf32> to vector<64x128xf32>
    %5 = arith.addf %2, %4 : vector<64x128xf32>
    %c0_5 = arith.constant 0 : index
    %c0_6 = arith.constant 0 : index
    %6 = vector.load %arg5[%c0_5, %c0_6] : memref<64x128xf32, #tpu.memory_space<vmem>>, vector<64x128xf32>
    tpu.vector_store %arg5[%c0_5, %c0_6], %5 {strides = array<i32>} : memref<64x128xf32, #tpu.memory_space<vmem>>, vector<64x128xf32>,
    return
  }
  func.func @transform_0(%arg0: i32, %arg1: i32) -> (i32, i32) {
    %c0_i32 = arith.constant 0 : i32
    %c0_i32_0 = arith.constant 0 : i32
    return %arg0, %c0_i32 : i32, i32
  }
  func.func @transform_1(%arg0: i32, %arg1: i32) -> (i32, i32) {
    %c0_i32 = arith.constant 0 : i32
    %c0_i32_0 = arith.constant 0 : i32
    return %c0_i32, %arg1 : i32, i32
  }
  func.func @transform_2(%arg0: i32, %arg1: i32) -> (i32, i32) {
    %c0_i32 = arith.constant 0 : i32
    %c0_i32_0 = arith.constant 0 : i32
    return %c0_i32, %arg1 : i32, i32
  }
  func.func @transform_3(%arg0: i32, %arg1: i32) -> (i32, i32) {
    %c0_i32 = arith.constant 0 : i32
    return %arg0, %arg1 : i32, i32
  }
}

module attributes {stable_mosaic.version = 11 : i64} {
  func.func @lstm_recurrence_kernel(%arg0: i32, %arg1: memref<8x8x512xf32, #tpu.memory_space<vmem>>, %arg2: memref<128x512xbf16, #tpu.memory_space<vmem>>, %arg3: memref<8x128xf32, #tpu.memory_space<vmem>>, %arg4: memref<8x128xf32, #tpu.memory_space<vmem>>, %arg5: memref<8x8x128xf32, #tpu.memory_space<vmem>>, %arg6: memref<8x128xf32, #tpu.memory_space<vmem>>, %arg7: memref<8x128xf32, #tpu.memory_space<vmem>>) attributes {dimension_semantics = [#tpu.dimension_semantics<arbitrary>], iteration_bounds = array<i64: 1>, scalar_prefetch = 0 : i64, scratch_operands = 0 : i64, tpu.core_type = #tpu.core_type<tc>, window_params = [{pipeline_mode = #tpu.pipeline_mode<synchronous>, transform_indices = @transform_0, window_bounds = array<i64: 8, 8, 512>}, {pipeline_mode = #tpu.pipeline_mode<synchronous>, transform_indices = @transform_1, window_bounds = array<i64: 128, 512>}, {pipeline_mode = #tpu.pipeline_mode<synchronous>, transform_indices = @transform_2, window_bounds = array<i64: 8, 128>}, {pipeline_mode = #tpu.pipeline_mode<synchronous>, transform_indices = @transform_3, window_bounds = array<i64: 8, 128>}, {pipeline_mode = #tpu.pipeline_mode<synchronous>, transform_indices = @transform_4, window_bounds = array<i64: 8, 8, 128>}, {pipeline_mode = #tpu.pipeline_mode<synchronous>, transform_indices = @transform_5, window_bounds = array<i64: 8, 128>}, {pipeline_mode = #tpu.pipeline_mode<synchronous>, transform_indices = @transform_6, window_bounds = array<i64: 8, 128>}]} {
    %c0 = arith.constant 0 : index
    %c0_0 = arith.constant 0 : index
    %0 = vector.load %arg2[%c0, %c0_0] : memref<128x512xbf16, #tpu.memory_space<vmem>>, vector<128x512xbf16>
    %c0_1 = arith.constant 0 : index
    %c0_2 = arith.constant 0 : index
    %1 = vector.load %arg3[%c0_1, %c0_2] : memref<8x128xf32, #tpu.memory_space<vmem>>, vector<8x128xf32>
    %c0_3 = arith.constant 0 : index
    %c0_4 = arith.constant 0 : index
    %2 = vector.load %arg4[%c0_3, %c0_4] : memref<8x128xf32, #tpu.memory_space<vmem>>, vector<8x128xf32>
    %c0_i32 = arith.constant 0 : i32
    %c8_i32 = arith.constant 8 : i32
    %3 = arith.addi %c0_i32, %c8_i32 : i32
    %c1_i32 = arith.constant 1 : i32
    %4:2 = scf.for %arg8 = %c0_i32 to %3 step %c1_i32 iter_args(%arg9 = %1, %arg10 = %2) -> (vector<8x128xf32>, vector<8x128xf32>)  : i32 {
      %7 = arith.index_cast %arg8 : i32 to index
      %c0_10 = arith.constant 0 : index
      %c0_11 = arith.constant 0 : index
      %8 = vector.load %arg1[%7, %c0_10, %c0_11] : memref<8x8x512xf32, #tpu.memory_space<vmem>>, vector<1x8x512xf32>
      %9 = vector.shape_cast %8 : vector<1x8x512xf32> to vector<8x512xf32>
      %10 = arith.truncf %arg9 : vector<8x128xf32> to vector<8x128xbf16>
      %cst = arith.constant dense<0.000000e+00> : vector<8x512xf32>
      %11 = tpu.matmul %10, %0, %cst {dimension_numbers = #tpu.dot_dimension_numbers<[1], [0], [0], [1], [0, 0, 1, 1], [], []>} : vector<8x128xbf16>, vector<128x512xbf16>, vector<8x512xf32> -> vector<8x512xf32>
      %12 = arith.addf %9, %11 : vector<8x512xf32>
      %13 = vector.extract_strided_slice %12 {offsets = [0, 0], sizes = [8, 128], strides = [1, 1]} : vector<8x512xf32> to vector<8x128xf32>
      %14 = arith.negf %13 : vector<8x128xf32>
      %15 = math.exp %14 : vector<8x128xf32>
      %cst_12 = arith.constant 1.000000e+00 : f32
      %16 = vector.broadcast %cst_12 : f32 to vector<8x128xf32>
      %17 = arith.addf %16, %15 : vector<8x128xf32>
      %18 = arith.divf %16, %17 : vector<8x128xf32>
      %19 = vector.extract_strided_slice %12 {offsets = [0, 128], sizes = [8, 128], strides = [1, 1]} : vector<8x512xf32> to vector<8x128xf32>
      %20 = arith.negf %19 : vector<8x128xf32>
      %21 = math.exp %20 : vector<8x128xf32>
      %cst_13 = arith.constant 1.000000e+00 : f32
      %22 = vector.broadcast %cst_13 : f32 to vector<8x128xf32>
      %23 = arith.addf %22, %21 : vector<8x128xf32>
      %24 = arith.divf %22, %23 : vector<8x128xf32>
      %25 = vector.extract_strided_slice %12 {offsets = [0, 256], sizes = [8, 128], strides = [1, 1]} : vector<8x512xf32> to vector<8x128xf32>
      %26 = math.tanh %25 : vector<8x128xf32>
      %27 = vector.extract_strided_slice %12 {offsets = [0, 384], sizes = [8, 128], strides = [1, 1]} : vector<8x512xf32> to vector<8x128xf32>
      %28 = arith.negf %27 : vector<8x128xf32>
      %29 = math.exp %28 : vector<8x128xf32>
      %cst_14 = arith.constant 1.000000e+00 : f32
      %30 = vector.broadcast %cst_14 : f32 to vector<8x128xf32>
      %31 = arith.addf %30, %29 : vector<8x128xf32>
      %32 = arith.divf %30, %31 : vector<8x128xf32>
      %33 = arith.mulf %24, %arg10 : vector<8x128xf32>
      %34 = arith.mulf %18, %26 : vector<8x128xf32>
      %35 = arith.addf %33, %34 : vector<8x128xf32>
      %36 = math.tanh %35 : vector<8x128xf32>
      %37 = arith.mulf %32, %36 : vector<8x128xf32>
      %38 = arith.index_cast %arg8 : i32 to index
      %c0_15 = arith.constant 0 : index
      %c0_16 = arith.constant 0 : index
      %39 = vector.load %arg5[%38, %c0_15, %c0_16] : memref<8x8x128xf32, #tpu.memory_space<vmem>>, vector<1x8x128xf32>
      %40 = vector.shape_cast %39 : vector<1x8x128xf32> to vector<8x128xf32>
      %41 = vector.shape_cast %37 : vector<8x128xf32> to vector<1x8x128xf32>
      tpu.vector_store %arg5[%38, %c0_15, %c0_16], %41 {strides = array<i32>} : memref<8x8x128xf32, #tpu.memory_space<vmem>>, vector<1x8x128xf32>,
      scf.yield %37, %35 : vector<8x128xf32>, vector<8x128xf32>
    }
    %c8_i32_5 = arith.constant 8 : i32
    %c0_6 = arith.constant 0 : index
    %c0_7 = arith.constant 0 : index
    %5 = vector.load %arg6[%c0_6, %c0_7] : memref<8x128xf32, #tpu.memory_space<vmem>>, vector<8x128xf32>
    tpu.vector_store %arg6[%c0_6, %c0_7], %4#0 {strides = array<i32>} : memref<8x128xf32, #tpu.memory_space<vmem>>, vector<8x128xf32>,
    %c0_8 = arith.constant 0 : index
    %c0_9 = arith.constant 0 : index
    %6 = vector.load %arg7[%c0_8, %c0_9] : memref<8x128xf32, #tpu.memory_space<vmem>>, vector<8x128xf32>
    tpu.vector_store %arg7[%c0_8, %c0_9], %4#1 {strides = array<i32>} : memref<8x128xf32, #tpu.memory_space<vmem>>, vector<8x128xf32>,
    return
  }
  func.func @transform_0(%arg0: i32) -> (i32, i32, i32) {
    %c0_i32 = arith.constant 0 : i32
    %c0_i32_0 = arith.constant 0 : i32
    %c0_i32_1 = arith.constant 0 : i32
    %c0_i32_2 = arith.constant 0 : i32
    return %c0_i32, %c0_i32_0, %c0_i32_1 : i32, i32, i32
  }
  func.func @transform_1(%arg0: i32) -> (i32, i32) {
    %c0_i32 = arith.constant 0 : i32
    %c0_i32_0 = arith.constant 0 : i32
    %c0_i32_1 = arith.constant 0 : i32
    return %c0_i32, %c0_i32_0 : i32, i32
  }
  func.func @transform_2(%arg0: i32) -> (i32, i32) {
    %c0_i32 = arith.constant 0 : i32
    %c0_i32_0 = arith.constant 0 : i32
    %c0_i32_1 = arith.constant 0 : i32
    return %c0_i32, %c0_i32_0 : i32, i32
  }
  func.func @transform_3(%arg0: i32) -> (i32, i32) {
    %c0_i32 = arith.constant 0 : i32
    %c0_i32_0 = arith.constant 0 : i32
    %c0_i32_1 = arith.constant 0 : i32
    return %c0_i32, %c0_i32_0 : i32, i32
  }
  func.func @transform_4(%arg0: i32) -> (i32, i32, i32) {
    %c0_i32 = arith.constant 0 : i32
    %c0_i32_0 = arith.constant 0 : i32
    %c0_i32_1 = arith.constant 0 : i32
    %c0_i32_2 = arith.constant 0 : i32
    return %c0_i32, %c0_i32_0, %c0_i32_1 : i32, i32, i32
  }
  func.func @transform_5(%arg0: i32) -> (i32, i32) {
    %c0_i32 = arith.constant 0 : i32
    %c0_i32_0 = arith.constant 0 : i32
    %c0_i32_1 = arith.constant 0 : i32
    return %c0_i32, %c0_i32_0 : i32, i32
  }
  func.func @transform_6(%arg0: i32) -> (i32, i32) {
    %c0_i32 = arith.constant 0 : i32
    %c0_i32_0 = arith.constant 0 : i32
    %c0_i32_1 = arith.constant 0 : i32
    return %c0_i32, %c0_i32_0 : i32, i32
  }
}

</mosaic_0001>

<bundles_post_ra>
// kernel: rnn_model_forward.5
= control target key start
LH: loop header
LB: loop body
LE: loop exit
PB: predicated region body
PF: predicated region fallthrough
CT: control target
= control target key end

     0   :  { %s355_s1 = inlined_call_operand.vmem [shape: bf16[128,128], index: 1, kind: input, shape index: {}]   ;;  %s356_s0 = inlined_call_operand.vmem [shape: bf16[64,128], index: 0, kind: input, shape index: {}]   ;;  %s357_s2 = inlined_call_operand.vmem [shape: f32[1,128], index: 2, kind: input, shape index: {}]   ;;  %s358_s3 = inlined_call_operand.vmem [shape: f32[64,128], index: 3, kind: output, shape index: {}]  }
   0x1   :  { %v260_v0 = vld [vmem:[%s355_s1] sm:$0xff]   ;;  %v261_v1 = vld [vmem:[%s355_s1 + $0x8] sm:$0xff]   ;;  %v262_v2 = vld [vmem:[%s355_s1 + $0x10] sm:$0xff]  }
   0x2   :  { %220 = vmatprep.subr.bf16.mxu0 %v260_v0  ;;  %244 = vmatprep.subr.bf16.mxu1 %v260_v0  ;;  %v263_v3 = vld [vmem:[%s355_s1 + $0x18] sm:$0xff]   ;;  %v268_v4 = vld [vmem:[%s356_s0] sm:$0xff]   ;;  %v269_v5 = vld [vmem:[%s356_s0 + $0x10] sm:$0xff]  }
   0x3   :  { %221 = vmatpush3.bf16.msra.mxu0 %v260_v0  ;;  %252 = vmatpush3.bf16.msra.mxu1 %v260_v0  ;;  %v264_v6 = vld [vmem:[%s355_s1 + $0x20] sm:$0xff]   ;;  %v265_v7 = vld [vmem:[%s355_s1 + $0x28] sm:$0xff]   ;;  %v266_v8 = vld [vmem:[%s355_s1 + $0x30] sm:$0xff]  }
   0x4   :  { %222 = vmatprep.subr.bf16.mxu0 %v261_v1  ;;  %245 = vmatprep.subr.bf16.mxu1 %v261_v1  ;;  %v267_v9 = vld [vmem:[%s355_s1 + $0x38] sm:$0xff]   ;;  %v270_v10 = vld [vmem:[%s356_s0 + $0x8] sm:$0xff]   ;;  %v195_v12 = vld [vmem:[%s357_s2] ss:$0 sm:$0xff] }
   0x5   :  { %236 = vmatprep.mubr.bf16.mxu0 %v268_v4  ;;  %240 = vmatprep.mubr.bf16.mxu1 %v269_v5  ;;  %v271_v11 = vld [vmem:[%s356_s0 + $0x18] sm:$0xff]  }
   0x7   :  { %223 = vmatpush3.bf16.msra.mxu0 %v261_v1  ;;  %253 = vmatpush3.bf16.msra.mxu1 %v261_v1 }
   0x8   :  { %224 = vmatprep.subr.bf16.mxu0 %v262_v2  ;;  %246 = vmatprep.subr.bf16.mxu1 %v262_v2 }
   0xb   :  { %225 = vmatpush3.bf16.msra.mxu0 %v262_v2  ;;  %254 = vmatpush3.bf16.msra.mxu1 %v262_v2 }
   0xc   :  { %226 = vmatprep.subr.bf16.mxu0 %v263_v3  ;;  %247 = vmatprep.subr.bf16.mxu1 %v263_v3 }
   0xf   :  { %227 = vmatpush3.bf16.msra.mxu0 %v263_v3  ;;  %255 = vmatpush3.bf16.msra.mxu1 %v263_v3 }
  0x10   :  { %228 = vmatprep.subr.bf16.mxu0 %v264_v6  ;;  %248 = vmatprep.subr.bf16.mxu1 %v264_v6 }
  0x13   :  { %229 = vmatpush3.bf16.msra.mxu0 %v264_v6  ;;  %256 = vmatpush3.bf16.msra.mxu1 %v264_v6 }
  0x14   :  { %230 = vmatprep.subr.bf16.mxu0 %v265_v7  ;;  %249 = vmatprep.subr.bf16.mxu1 %v265_v7 }
  0x17   :  { %231 = vmatpush3.bf16.msra.mxu0 %v265_v7  ;;  %257 = vmatpush3.bf16.msra.mxu1 %v265_v7 }
  0x18   :  { %232 = vmatprep.subr.bf16.mxu0 %v266_v8  ;;  %250 = vmatprep.subr.bf16.mxu1 %v266_v8 }
  0x1b   :  { %233 = vmatpush3.bf16.msra.mxu0 %v266_v8  ;;  %258 = vmatpush3.bf16.msra.mxu1 %v266_v8 }
  0x1c   :  { %234 = vmatprep.subr.bf16.mxu0 %v267_v9  ;;  %251 = vmatprep.subr.bf16.mxu1 %v267_v9 }
  0x1f   :  { %235 = vmatpush3.bf16.msra.mxu0 %v267_v9  ;;  %259 = vmatpush3.bf16.msra.mxu1 %v267_v9 }
  0x22   :  { %237 = vmatmul.mubr.bf16.vlgmr.msra.gmra.mrb[0].mxu0 %v270_v10  ;;  %241 = vmatmul.mubr.bf16.vlgmr.msra.gmra.mrb[0].mxu1 %v271_v11 }
  0xf5   :  { %v238_v13 = vpop.f32.mrb[0].mxu0  ;;  %v242_v14 = vpop.f32.mrb[0].mxu1 }
  0xf6   :  { %v161_v15 = vadd.f32 %v238_v13, %v195_v12  ;;  %v177_v16 = vadd.f32 %v242_v14, %v195_v12  ;;  %v152_v17 = vpop.f32.mrb[1].mxu0  ;;  %v168_v18 = vpop.f32.mrb[1].mxu1 }
  0xf7   :  { %v153_v19 = vadd.f32 %v195_v12, %v152_v17  ;;  %v169_v20 = vadd.f32 %v195_v12, %v168_v18  ;;  %v239_v21 = vpop.f32.mrb[2].mxu0  ;;  %v243_v22 = vpop.f32.mrb[2].mxu1 }
  0xf8   :  { %185 = vst [vmem:[%s358_s3 + $0x10] sm:$0xff] %v161_v15  ;;  %189 = vst [vmem:[%s358_s3 + $0x30] sm:$0xff] %v177_v16  ;;  %v164_v23 = vadd.f32 %v239_v21, %v195_v12  ;;  %v180_v24 = vadd.f32 %v243_v22, %v195_v12  ;;  %v155_v25 = vpop.f32.mrb[3].mxu0  ;;  %v171_v26 = vpop.f32.mrb[3].mxu1 }
  0xf9   :  { %183 = vst [vmem:[%s358_s3] sm:$0xff] %v153_v19  ;;  %187 = vst [vmem:[%s358_s3 + $0x20] sm:$0xff] %v169_v20  ;;  %v156_v27 = vadd.f32 %v195_v12, %v155_v25  ;;  %v172_v28 = vadd.f32 %v195_v12, %v171_v26 }
  0xfa   :  { %186 = vst [vmem:[%s358_s3 + $0x18] sm:$0xff] %v164_v23  ;;  %190 = vst [vmem:[%s358_s3 + $0x38] sm:$0xff] %v180_v24 }
  0xfb   :  { %184 = vst [vmem:[%s358_s3 + $0x8] sm:$0xff] %v156_v27  ;;  %188 = vst [vmem:[%s358_s3 + $0x28] sm:$0xff] %v172_v28 }

// kernel: rnn_model_forward.3
= control target key start
LH: loop header
LB: loop body
LE: loop exit
PB: predicated region body
PF: predicated region fallthrough
CT: control target
= control target key end

     0   :  { %v345_v1 = vmov 0   ;;  %vm113_vm0 = vcmask 261120   ;;  %v33_v13 = vlaneseq  ;;  %s549_s1 = inlined_call_operand.vmem [shape: bf16[32,512], index: 1, kind: input, shape index: {}]   ;;  %s550_s0 = inlined_call_operand.vmem [shape: bf16[64,32], index: 0, kind: input, shape index: {}]   ;;  %s551_s2 = inlined_call_operand.vmem [shape: f32[1,512], index: 2, kind: input, shape index: {}]   ;;  %s552_s3 = inlined_call_operand.vmem [shape: f32[64,512], index: 3, kind: output, shape index: {}]  }
   0x1   :  { %v329_v0 = vld [vmem:[%s549_s1 + $0x4] ss:$16 sps:$4 sm:$0xff]   ;;  %158 = vmatprep.mubr.bf16.mxu0 %v345_v1  ;;  %231 = vmatprep.mubr.bf16.mxu1 %v345_v1  ;;  %v331_v2 = vld [vmem:[%s549_s1 + $0xc] ss:$16 sps:$4 sm:$0xff]   ;;  %v333_v3 = vld [vmem:[%s549_s1] ss:$16 sps:$4 sm:$0xff]  }
   0x2   :  { %126 = vmatprep.subr.bf16.mxu0 %v329_v0  ;;  %v334_v4 = vld [vmem:[%s549_s1 + $0x8] ss:$16 sps:$4 sm:$0xff]   ;;  %199 = vmatprep.subr.bf16.mxu1 %v331_v2  ;;  %v335_v5 = vld [vmem:[%s549_s1 + $0x24] ss:$16 sps:$4 sm:$0xff]   ;;  %v337_v6 = vld [vmem:[%s549_s1 + $0x2c] ss:$16 sps:$4 sm:$0xff]  }
   0x3   :  { %127 = vmatpush1.bf16.msra.mxu0 %v333_v3  ;;  %200 = vmatpush1.bf16.msra.mxu1 %v334_v4  ;;  %v339_v7 = vld [vmem:[%s549_s1 + $0x20] ss:$16 sps:$4 sm:$0xff]   ;;  %v340_v8 = vld [vmem:[%s549_s1 + $0x28] ss:$16 sps:$4 sm:$0xff]   ;;  %v34_v14 = vshrl.u32 %v33_v13, 7 }
   0x4   :  { %128 = vmatprep.subr.bf16.mxu0 %v335_v5  ;;  %201 = vmatprep.subr.bf16.mxu1 %v337_v6  ;;  %v341_v9 = vld [vmem:[%s550_s0] sm:$0xff]   ;;  %v342_v10 = vld [vmem:[%s550_s0 + $0x8] sm:$0xff]   ;;  %v343_v11 = vld [vmem:[%s550_s0 + $0x10] sm:$0xff]  }
   0x5   :  { %v344_v12 = vld [vmem:[%s550_s0 + $0x18] sm:$0xff]   ;;  %v35_v15 = vsub.s32 0, %v34_v14  ;;  %v43_v16 = vsub.s32 2, %v34_v14  ;;  %v31_v17 = vld [vmem:[%s551_s2] sm:$0xf]  ;;  %v39_v18 = vsub.s32 1, %v34_v14 }
   0x6   :  { %v47_v19 = vsub.s32 3, %v34_v14 }
   0x7   :  { %129 = vmatpush1.bf16.msra.mxu0 %v339_v7  ;;  %202 = vmatpush1.bf16.msra.mxu1 %v340_v8  ;;  %v413_v20 = vrot.slane %v31_v17, %v35_v15  ;;  %v415_v21 = vrot.slane %v31_v17, %v43_v16  ;;  %v417_v22 = vrot.slane %v31_v17, %v39_v18 }
   0x8   :  { %v419_v23 = vrot.slane %v31_v17, %v47_v19 }
   0xa   :  { %320 = vmatmul.mubr.msk.bf16.vlgmr.msra.gmra.mrb[0].mxu0 %vm113_vm0, %v341_v9  ;;  %324 = vmatmul.mubr.msk.bf16.vlgmr.msra.gmra.mrb[0].mxu1 %vm113_vm0, %v341_v9 }
   0xb   :  { %168 = vmatprep.mubr.bf16.mxu0 %v345_v1  ;;  %241 = vmatprep.mubr.bf16.mxu1 %v345_v1 }
  0x12   :  { %321 = vmatmul.mubr.msk.bf16.gmra.mrb[4].mxu0 %vm113_vm0, %v342_v10  ;;  %325 = vmatmul.mubr.msk.bf16.gmra.mrb[4].mxu1 %vm113_vm0, %v342_v10 }
  0x13   :  { %178 = vmatprep.mubr.bf16.mxu0 %v345_v1  ;;  %251 = vmatprep.mubr.bf16.mxu1 %v345_v1 }
  0x1a   :  { %322 = vmatmul.mubr.msk.bf16.gmra.mrb[8].mxu0 %vm113_vm0, %v343_v11  ;;  %326 = vmatmul.mubr.msk.bf16.gmra.mrb[8].mxu1 %vm113_vm0, %v343_v11 }
  0x1b   :  { %188 = vmatprep.mubr.bf16.mxu0 %v345_v1  ;;  %261 = vmatprep.mubr.bf16.mxu1 %v345_v1 }
  0x22   :  { %323 = vmatmul.mubr.msk.bf16.gmra.mrb[12].mxu0 %vm113_vm0, %v344_v12  ;;  %327 = vmatmul.mubr.msk.bf16.gmra.mrb[12].mxu1 %vm113_vm0, %v344_v12 }
  0xdd   :  { %v160_v24 = vpop.f32.mrb[0].mxu0  ;;  %v233_v25 = vpop.f32.mrb[0].mxu1 }
  0xde   :  { %v161_v26 = vadd.f32 %v160_v24, %v413_v20  ;;  %v234_v27 = vadd.f32 %v233_v25, %v415_v21  ;;  %v162_v28 = vpop.f32.mrb[1].mxu0  ;;  %v235_v29 = vpop.f32.mrb[1].mxu1 }
  0xdf   :  { %v163_v30 = vadd.f32 %v162_v28, %v417_v22  ;;  %v236_v31 = vadd.f32 %v235_v29, %v419_v23  ;;  %v164_v32 = vpop.f32.mrb[2].mxu0  ;;  %v237_v33 = vpop.f32.mrb[2].mxu1 }
  0xe0   :  { %272 = vst [vmem:[%s552_s3] sm:$0xff] %v161_v26  ;;  %274 = vst [vmem:[%s552_s3 + $0x10] sm:$0xff] %v234_v27  ;;  %v165_v34 = vadd.f32 %v164_v32, %v413_v20  ;;  %v238_v35 = vadd.f32 %v237_v33, %v415_v21  ;;  %v166_v36 = vpop.f32.mrb[3].mxu0  ;;  %v239_v37 = vpop.f32.mrb[3].mxu1 }
  0xe1   :  { %273 = vst [vmem:[%s552_s3 + $0x8] sm:$0xff] %v163_v30  ;;  %275 = vst [vmem:[%s552_s3 + $0x18] sm:$0xff] %v236_v31  ;;  %v167_v38 = vadd.f32 %v166_v36, %v417_v22  ;;  %v240_v39 = vadd.f32 %v239_v37, %v419_v23 }
  0xe2   :  { %276 = vst [vmem:[%s552_s3 + $0x20] sm:$0xff] %v165_v34  ;;  %278 = vst [vmem:[%s552_s3 + $0x30] sm:$0xff] %v238_v35 }
  0xe3   :  { %277 = vst [vmem:[%s552_s3 + $0x28] sm:$0xff] %v167_v38  ;;  %279 = vst [vmem:[%s552_s3 + $0x38] sm:$0xff] %v240_v39 }
  0xe5   :  { %v170_v40 = vpop.f32.mrb[4].mxu0  ;;  %v243_v41 = vpop.f32.mrb[4].mxu1 }
  0xe6   :  { %v171_v42 = vadd.f32 %v170_v40, %v413_v20  ;;  %v244_v43 = vadd.f32 %v243_v41, %v415_v21  ;;  %v172_v44 = vpop.f32.mrb[5].mxu0  ;;  %v245_v45 = vpop.f32.mrb[5].mxu1 }
  0xe7   :  { %v173_v46 = vadd.f32 %v172_v44, %v417_v22  ;;  %v246_v47 = vadd.f32 %v245_v45, %v419_v23  ;;  %v174_v48 = vpop.f32.mrb[6].mxu0  ;;  %v247_v49 = vpop.f32.mrb[6].mxu1 }
  0xe8   :  { %280 = vst [vmem:[%s552_s3 + $0x40] sm:$0xff] %v171_v42  ;;  %282 = vst [vmem:[%s552_s3 + $0x50] sm:$0xff] %v244_v43  ;;  %v175_v50 = vadd.f32 %v174_v48, %v413_v20  ;;  %v248_v51 = vadd.f32 %v247_v49, %v415_v21  ;;  %v176_v52 = vpop.f32.mrb[7].mxu0  ;;  %v249_v53 = vpop.f32.mrb[7].mxu1 }
  0xe9   :  { %281 = vst [vmem:[%s552_s3 + $0x48] sm:$0xff] %v173_v46  ;;  %283 = vst [vmem:[%s552_s3 + $0x58] sm:$0xff] %v246_v47  ;;  %v177_v54 = vadd.f32 %v176_v52, %v417_v22  ;;  %v250_v55 = vadd.f32 %v249_v53, %v419_v23 }
  0xea   :  { %284 = vst [vmem:[%s552_s3 + $0x60] sm:$0xff] %v175_v50  ;;  %286 = vst [vmem:[%s552_s3 + $0x70] sm:$0xff] %v248_v51 }
  0xeb   :  { %285 = vst [vmem:[%s552_s3 + $0x68] sm:$0xff] %v177_v54  ;;  %287 = vst [vmem:[%s552_s3 + $0x78] sm:$0xff] %v250_v55 }
  0xed   :  { %v180_v56 = vpop.f32.mrb[8].mxu0  ;;  %v253_v57 = vpop.f32.mrb[8].mxu1 }
  0xee   :  { %v181_v58 = vadd.f32 %v180_v56, %v413_v20  ;;  %v254_v59 = vadd.f32 %v253_v57, %v415_v21  ;;  %v182_v60 = vpop.f32.mrb[9].mxu0  ;;  %v255_v61 = vpop.f32.mrb[9].mxu1 }
  0xef   :  { %v183_v62 = vadd.f32 %v182_v60, %v417_v22  ;;  %v256_v63 = vadd.f32 %v255_v61, %v419_v23  ;;  %v184_v0 = vpop.f32.mrb[10].mxu0  ;;  %v257_v1 = vpop.f32.mrb[10].mxu1 }
  0xf0   :  { %288 = vst [vmem:[%s552_s3 + $0x80] sm:$0xff] %v181_v58  ;;  %290 = vst [vmem:[%s552_s3 + $0x90] sm:$0xff] %v254_v59  ;;  %v185_v2 = vadd.f32 %v184_v0, %v413_v20  ;;  %v258_v3 = vadd.f32 %v257_v1, %v415_v21  ;;  %v186_v4 = vpop.f32.mrb[11].mxu0  ;;  %v259_v5 = vpop.f32.mrb[11].mxu1 }
  0xf1   :  { %289 = vst [vmem:[%s552_s3 + $0x88] sm:$0xff] %v183_v62  ;;  %291 = vst [vmem:[%s552_s3 + $0x98] sm:$0xff] %v256_v63  ;;  %v187_v6 = vadd.f32 %v186_v4, %v417_v22  ;;  %v260_v7 = vadd.f32 %v259_v5, %v419_v23 }
  0xf2   :  { %292 = vst [vmem:[%s552_s3 + $0xa0] sm:$0xff] %v185_v2  ;;  %294 = vst [vmem:[%s552_s3 + $0xb0] sm:$0xff] %v258_v3 }
  0xf3   :  { %293 = vst [vmem:[%s552_s3 + $0xa8] sm:$0xff] %v187_v6  ;;  %295 = vst [vmem:[%s552_s3 + $0xb8] sm:$0xff] %v260_v7 }
  0xf5   :  { %v190_v8 = vpop.f32.mrb[12].mxu0  ;;  %v263_v9 = vpop.f32.mrb[12].mxu1 }
  0xf6   :  { %v191_v10 = vadd.f32 %v190_v8, %v413_v20  ;;  %v264_v11 = vadd.f32 %v263_v9, %v415_v21  ;;  %v192_v12 = vpop.f32.mrb[13].mxu0  ;;  %v265_v13 = vpop.f32.mrb[13].mxu1 }
  0xf7   :  { %v193_v14 = vadd.f32 %v192_v12, %v417_v22  ;;  %v266_v15 = vadd.f32 %v265_v13, %v419_v23  ;;  %v194_v16 = vpop.f32.mrb[14].mxu0  ;;  %v267_v17 = vpop.f32.mrb[14].mxu1 }
  0xf8   :  { %296 = vst [vmem:[%s552_s3 + $0xc0] sm:$0xff] %v191_v10  ;;  %298 = vst [vmem:[%s552_s3 + $0xd0] sm:$0xff] %v264_v11  ;;  %v195_v18 = vadd.f32 %v194_v16, %v413_v20  ;;  %v268_v19 = vadd.f32 %v267_v17, %v415_v21  ;;  %v196_v24 = vpop.f32.mrb[15].mxu0  ;;  %v269_v25 = vpop.f32.mrb[15].mxu1 }
  0xf9   :  { %297 = vst [vmem:[%s552_s3 + $0xc8] sm:$0xff] %v193_v14  ;;  %299 = vst [vmem:[%s552_s3 + $0xd8] sm:$0xff] %v266_v15  ;;  %v197_v26 = vadd.f32 %v196_v24, %v417_v22  ;;  %v270_v27 = vadd.f32 %v269_v25, %v419_v23 }
  0xfa   :  { %300 = vst [vmem:[%s552_s3 + $0xe0] sm:$0xff] %v195_v18  ;;  %302 = vst [vmem:[%s552_s3 + $0xf0] sm:$0xff] %v268_v19 }
  0xfb   :  { %301 = vst [vmem:[%s552_s3 + $0xe8] sm:$0xff] %v197_v26  ;;  %303 = vst [vmem:[%s552_s3 + $0xf8] sm:$0xff] %v270_v27 }

// kernel: rnn_model_forward.4
= control target key start
LH: loop header
LB: loop body
LE: loop exit
PB: predicated region body
PF: predicated region fallthrough
CT: control target
= control target key end

     0   :  { %s683_s17 = smov 0   ;;  %s782_s0 = inlined_call_operand.vmem [shape: f32[8,8,512], index: 0, kind: input, shape index: {}]   ;;  %s783_s1 = inlined_call_operand.vmem [shape: bf16[128,512], index: 1, kind: input, shape index: {}]   ;;  %s784_s4 = inlined_call_operand.vmem [shape: f32[8,8,128], index: 4, kind: output, shape index: {0}]   ;;  %s785_s5 = inlined_call_operand.vmem [shape: f32[8,128], index: 5, kind: output, shape index: {1}]   ;;  %s786_s6 = inlined_call_operand.vmem [shape: f32[8,128], index: 6, kind: output, shape index: {2}]   ;;  %s787_s2 = inlined_call_operand.vmem [shape: f32[8,128], index: 2, kind: input, shape index: {}]   ;;  %s788_s3 = inlined_call_operand.vmem [shape: f32[8,128], index: 3, kind: input, shape index: {}]  }
   0x1   :  { %v516_v0 = vld [vmem:[%s783_s1] sm:$0xff]  ;;  %v521_v1 = vld [vmem:[%s783_s1 + $0x8] sm:$0xff]  ;;  %v526_v2 = vld [vmem:[%s783_s1 + $0x10] sm:$0xff] }
   0x2   :  { %v531_v3 = vld [vmem:[%s783_s1 + $0x18] sm:$0xff]  ;;  %v536_v4 = vld [vmem:[%s783_s1 + $0x20] sm:$0xff]  ;;  %v541_v5 = vld [vmem:[%s783_s1 + $0x28] sm:$0xff] }
   0x3   :  { %v546_v6 = vld [vmem:[%s783_s1 + $0x30] sm:$0xff]  ;;  %v551_v7 = vld [vmem:[%s783_s1 + $0x38] sm:$0xff]  ;;  %v556_v8 = vld [vmem:[%s783_s1 + $0x40] sm:$0xff] }
   0x4   :  { %v561_v9 = vld [vmem:[%s783_s1 + $0x48] sm:$0xff]  ;;  %v566_v10 = vld [vmem:[%s783_s1 + $0x50] sm:$0xff]  ;;  %v571_v11 = vld [vmem:[%s783_s1 + $0x58] sm:$0xff] }
   0x5   :  { %v576_v12 = vld [vmem:[%s783_s1 + $0x60] sm:$0xff]  ;;  %v581_v13 = vld [vmem:[%s783_s1 + $0x68] sm:$0xff]  ;;  %v586_v14 = vld [vmem:[%s783_s1 + $0x70] sm:$0xff] }
   0x6   :  { %v591_v15 = vld [vmem:[%s783_s1 + $0x78] sm:$0xff]  ;;  %v596_v16 = vld [vmem:[%s783_s1 + $0x80] sm:$0xff]  ;;  %v601_v17 = vld [vmem:[%s783_s1 + $0x88] sm:$0xff] }
   0x7   :  { %v606_v18 = vld [vmem:[%s783_s1 + $0x90] sm:$0xff]  ;;  %v611_v19 = vld [vmem:[%s783_s1 + $0x98] sm:$0xff]  ;;  %v616_v20 = vld [vmem:[%s783_s1 + $0xa0] sm:$0xff] }
   0x8   :  { %v621_v21 = vld [vmem:[%s783_s1 + $0xa8] sm:$0xff]  ;;  %v626_v22 = vld [vmem:[%s783_s1 + $0xb0] sm:$0xff]  ;;  %v631_v23 = vld [vmem:[%s783_s1 + $0xb8] sm:$0xff] }
   0x9   :  { %v636_v24 = vld [vmem:[%s783_s1 + $0xc0] sm:$0xff]  ;;  %v641_v25 = vld [vmem:[%s783_s1 + $0xc8] sm:$0xff]  ;;  %v646_v26 = vld [vmem:[%s783_s1 + $0xd0] sm:$0xff] }
   0xa   :  { %v651_v27 = vld [vmem:[%s783_s1 + $0xd8] sm:$0xff]  ;;  %v656_v28 = vld [vmem:[%s783_s1 + $0xe0] sm:$0xff]  ;;  %v661_v29 = vld [vmem:[%s783_s1 + $0xe8] sm:$0xff] }
   0xb   :  { %v666_v30 = vld [vmem:[%s783_s1 + $0xf0] sm:$0xff]  ;;  %v671_v31 = vld [vmem:[%s783_s1 + $0xf8] sm:$0xff]  ;;  %v53_v32 = vld [vmem:[%s787_s2] sm:$0xff]  }
   0xc   :  { %v54_v33 = vld [vmem:[%s788_s3] sm:$0xff]  }
   0xd LB: > { %v376_v34 = vcombine.high %v516_v0, %v526_v2  ;;  %v375_v35 = vcombine.low %v516_v0, %v526_v2  ;;  %v380_v36 = vcombine.high %v536_v4, %v546_v6  ;;  %v378_v37 = vcombine.high %v521_v1, %v531_v3  ;;  %s411_s1 = sshll.u32 %s475_s17, 5  ;;  %s410_s19 = sshll.u32 %s475_s17, 3  ;;  %s475_s17 = sphi %s683_s17, %s60_s17   ;;  %v471_v32 = vphi %v53_v32, %v790_v32   ;;  %v467_v33 = vphi %v54_v33, %v789_v33  }
   0xe   : > { %v377_v38 = vcombine.low %v521_v1, %v531_v3  ;;  %v382_v39 = vcombine.high %v541_v5, %v551_v7  ;;  %v379_v40 = vcombine.low %v536_v4, %v546_v6  ;;  %v384_v41 = vcombine.high %v556_v8, %v566_v10  ;;  %s65_s18 = scalar_lea.vmem %s782_s0, %s411_s1  ;;  %s342_s22 = scalar_lea.vmem %s784_s4, %s410_s19 }
   0xf   : > { %231 = vmatprep.subr.bf16.mxu0 %v376_v34  ;;  %272 = vmatprep.subr.bf16.mxu1 %v378_v37  ;;  %v381_v42 = vcombine.low %v541_v5, %v551_v7  ;;  %v386_v43 = vcombine.high %v561_v9, %v571_v11  ;;  %v477_v44 = vmov 0   ;;  %v383_v45 = vcombine.low %v556_v8, %v566_v10  ;;  %s60_s17 = sadd.s32 1, %s475_s17  }
  0x10   : > { %232 = vmatpush1.bf16.msra.mxu0 %v375_v35  ;;  %273 = vmatpush1.bf16.msra.mxu1 %v377_v38  ;;  %v388_v46 = vcombine.high %v576_v12, %v586_v14  ;;  %v385_v47 = vcombine.low %v561_v9, %v571_v11  ;;  %v390_v48 = vcombine.high %v581_v13, %v591_v15  ;;  %v66_v38 = vld [vmem:[%s65_s18] sm:$0xff]  ;;  %p57_p0 = scmp.ge.s32.totalorder %s60_s17, 8  }
  0x11   : > { %233 = vmatprep.subr.bf16.mxu0 %v380_v36  ;;  %274 = vmatprep.subr.bf16.mxu1 %v382_v39  ;;  %v387_v49 = vcombine.low %v576_v12, %v586_v14  ;;  %v392_v50 = vcombine.high %v596_v16, %v606_v18  ;;  %v389_v51 = vcombine.low %v581_v13, %v591_v15  ;;  %v67_v39 = vld [vmem:[%s65_s18 + $0x8] sm:$0xff] }
  0x12   : > { %263 = vmatprep.mubr.bf16.mxu0 %v477_v44  ;;  %304 = vmatprep.mubr.bf16.mxu1 %v477_v44  ;;  %v394_v52 = vcombine.high %v601_v17, %v611_v19  ;;  %v391_v53 = vcombine.low %v596_v16, %v606_v18  ;;  %v396_v54 = vcombine.high %v616_v20, %v626_v22 }
  0x13   : > { %v393_v55 = vcombine.low %v601_v17, %v611_v19  ;;  %v398_v56 = vcombine.high %v621_v21, %v631_v23  ;;  %v395_v57 = vcombine.low %v616_v20, %v626_v22  ;;  %v400_v58 = vcombine.high %v636_v24, %v646_v26 }
  0x14   : > { %234 = vmatpush1.bf16.msra.mxu0 %v379_v40  ;;  %275 = vmatpush1.bf16.msra.mxu1 %v381_v42  ;;  %v397_v59 = vcombine.low %v621_v21, %v631_v23  ;;  %v402_v60 = vcombine.high %v641_v25, %v651_v27  ;;  %v399_v61 = vcombine.low %v636_v24, %v646_v26 }
  0x15   : > { %235 = vmatprep.subr.bf16.mxu0 %v384_v41  ;;  %276 = vmatprep.subr.bf16.mxu1 %v386_v43  ;;  %v404_v62 = vcombine.high %v656_v28, %v666_v30  ;;  %v401_v63 = vcombine.low %v641_v25, %v651_v27  ;;  %v406_v34 = vcombine.high %v661_v29, %v671_v31 }
  0x16   : > { %v403_v35 = vcombine.low %v656_v28, %v666_v30  ;;  %v405_v36 = vcombine.low %v661_v29, %v671_v31  ;;  %v70_v37 = vpack.c.bf16 %v471_v32, %v471_v32 }
  0x18   : > { %236 = vmatpush1.bf16.msra.mxu0 %v383_v45  ;;  %277 = vmatpush1.bf16.msra.mxu1 %v385_v47 }
  0x19   : > { %237 = vmatprep.subr.bf16.mxu0 %v388_v46  ;;  %278 = vmatprep.subr.bf16.mxu1 %v390_v48 }
  0x1c   : > { %238 = vmatpush1.bf16.msra.mxu0 %v387_v49  ;;  %279 = vmatpush1.bf16.msra.mxu1 %v389_v51 }
  0x1d   : > { %239 = vmatprep.subr.bf16.mxu0 %v392_v50  ;;  %280 = vmatprep.subr.bf16.mxu1 %v394_v52  ;;  %v69_v50 = vld [vmem:[%s65_s18 + $0x18] sm:$0xff] }
  0x20   : > { %240 = vmatpush1.bf16.msra.mxu0 %v391_v53  ;;  %281 = vmatpush1.bf16.msra.mxu1 %v393_v55  ;;  %v68_v53 = vld [vmem:[%s65_s18 + $0x10] sm:$0xff] }
  0x21   : > { %241 = vmatprep.subr.bf16.mxu0 %v396_v54  ;;  %282 = vmatprep.subr.bf16.mxu1 %v398_v56 }
  0x24   : > { %242 = vmatpush1.bf16.msra.mxu0 %v395_v57  ;;  %283 = vmatpush1.bf16.msra.mxu1 %v397_v59 }
  0x25   : > { %243 = vmatprep.subr.bf16.mxu0 %v400_v58  ;;  %284 = vmatprep.subr.bf16.mxu1 %v402_v60 }
  0x28   : > { %244 = vmatpush1.bf16.msra.mxu0 %v399_v61  ;;  %285 = vmatpush1.bf16.msra.mxu1 %v401_v63 }
  0x29   : > { %245 = vmatprep.subr.bf16.mxu0 %v404_v62  ;;  %286 = vmatprep.subr.bf16.mxu1 %v406_v34 }
  0x2c   : > { %246 = vmatpush1.bf16.msra.mxu0 %v403_v35  ;;  %287 = vmatpush1.bf16.msra.mxu1 %v405_v36 }
  0x2f   : > { %264 = vmatmul.mubr.bf16.vlgmr.msra.gmra.mrb[0].mxu0 %v70_v37  ;;  %305 = vmatmul.mubr.bf16.vlgmr.msra.gmra.mrb[0].mxu1 %v70_v37 }
 0x102   : > { %v265_v40 = vpop.f32.mrb[0].mxu0  ;;  %v306_v43 = vpop.f32.mrb[0].mxu1 }
 0x103   : > { %v313_v41 = vadd.f32 %v265_v40, %v66_v38  ;;  %v267_v42 = vpop.f32.mrb[1].mxu0  ;;  %v308_v46 = vpop.f32.mrb[1].mxu1  ;;  %v315_v55 = vadd.f32 %v306_v43, %v68_v53 }
 0x104   : > { %v314_v44 = vadd.f32 %v267_v42, %v67_v39  ;;  %v269_v45 = vpop.f32.mrb[2].mxu0  ;;  %v310_v48 = vpop.f32.mrb[2].mxu1  ;;  %v316_v52 = vadd.f32 %v308_v46, %v69_v50 }
 0x105   : > { %v407_v47 = vmul.f32 -1.442695, %v313_v41  ;;  %v270_v32 = vpop.f32.mrb[3].mxu0  ;;  %v311_v51 = vpop.f32.mrb[3].mxu1 }
 0x106   : > { %v408_v49 = vmul.f32 -1.442695, %v314_v44  ;;  %v409_v54 = vmul.f32 -1.442695, %v316_v52 }
 0x107   : > { %437 = vpow2.f32 %v407_v47 }
 0x108   : > { %439 = vpow2.f32 %v408_v49 }
 0x109   : > { %441 = vpow2.f32 %v409_v54 }
 0x10a   : > { %443 = vtanh.f32 %v315_v55 }
 0x111   : > { %v438_v56 = vpop.eup %437 }
 0x112   : > { %v440_v57 = vpop.eup %439  ;;  %v320_v58 = vadd.f32 1.0, %v438_v56 }
 0x113   : > { %v326_v59 = vadd.f32 1.0, %v440_v57  ;;  %v442_v60 = vpop.eup %441 }
 0x114   : > { %445 = vrcp.f32 %v320_v58  ;;  %v444_v61 = vpop.eup %443  ;;  %v333_v63 = vadd.f32 1.0, %v442_v60 }
 0x115   : > { %447 = vrcp.f32 %v326_v59 }
 0x116   : > { %449 = vrcp.f32 %v333_v63 }
 0x11e   : > { %v446_v62 = vpop.eup %445 }
 0x11f   : > { %v448_v34 = vpop.eup %447  ;;  %v337_v35 = vmul.f32 %v446_v62, %v444_v61 }
 0x120   : > { %v336_v36 = vmul.f32 %v467_v33, %v448_v34  ;;  %v450_v38 = vpop.eup %449 }
 0x122   : > { %v338_v37 = vadd.f32 %v337_v35, %v336_v36  }
 0x124   : > { %451 = vtanh.f32 %v338_v37  ;;  %v789_v33 = vmov %v338_v37  ;;  %345 = vst [vmem:[%s786_s6] sm:$0xff] (%p57_p0), %v338_v37 }
 0x12b   :  { %59 = sbr.rel (!%p57_p0) target bundleno = 13 (0xd), region = 61 }
 0x12e   : > { %v452_v39 = vpop.eup %451 }
 0x12f   : > { %v340_v40 = vmul.f32 %v452_v39, %v450_v38  }
 0x131   : > { %343 = vst [vmem:[%s342_s22] sm:$0xff] %v340_v40  ;;  %v790_v32 = vmov %v340_v40  ;;  %344 = vst [vmem:[%s785_s5] sm:$0xff] (%p57_p0), %v340_v40 }

</bundles_post_ra>
